<compile_context>
chip_gen: v5e
topology: v5e:2x2
jax: 0.10.0
libtpu: 0.0.40
codegen_flags: <defaults>
</compile_context>

<pallas_src>
import math

import numpy as np
import jax
import jax.numpy as jnp
from jax.experimental import pallas as pl
from jax.experimental.pallas import tpu as pltpu


def _round_up(x, m):
    return -(-x // m) * m


# ---------------------------------------------------------------------------
# Butterfly stage bookkeeping (host-side, tiny)
# ---------------------------------------------------------------------------
def _stage_coeffs(twiddles, increasing_strides, C):
    """Flatten the 4 ButterflyBmm layers into per-stage coefficients.

    Returns, in application order, tuples (A, B, j0, j1) with
      A, B : (C, K) float32  -- "left"/"right" coefficient per output channel
      j0, j1 : (C,) int      -- static input-channel indices
    so one stage maps chans -> A[c] * chans[j0[c]] + B[c] * chans[j1[c]].
    Semantics match butterfly_mult_torch (twiddle rows s-1 .. 2s-2 at stride s;
    output c = blk*2s + i*s + kk mixes inputs blk*2s + kk and blk*2s + s + kk
    with twiddle[k, s-1+kk, i, :]).
    """
    m = int(math.log2(C))
    stages = []
    for tw, inc in zip(twiddles, increasing_strides):
        log_strides = range(m) if inc else reversed(range(m))
        for ls in log_strides:
            s = 1 << ls
            a_cols, b_cols, j0, j1 = [], [], [], []
            for ci in range(C):
                kk = ci % s
                i = (ci // s) % 2
                blk = ci // (2 * s)
                j0.append(blk * 2 * s + kk)
                j1.append(blk * 2 * s + s + kk)
                a_cols.append(tw[:, s - 1 + kk, i, 0])   # (K,)
                b_cols.append(tw[:, s - 1 + kk, i, 1])   # (K,)
            stages.append((jnp.stack(a_cols, axis=0),    # (C, K)
                           jnp.stack(b_cols, axis=0),    # (C, K)
                           np.asarray(j0), np.asarray(j1)))
    return stages


def _compose_weight(twiddles, last_bias, increasing_strides, C, K):
    """Pre-compose butterfly stages + bias + mean-over-K into (W, b).

    out[c, p] = sum_{ci,k} W[c, ci*K + k] * x[ci, k, p] + b[c]
    with W[c, ci*K + k] = M_k[c, ci] / K and b = mean_k(last_bias[k]).
    """
    # M[k] is the composed C x C butterfly matrix for kernel position k.
    M = jnp.broadcast_to(jnp.eye(C, dtype=jnp.float32), (K, C, C))
    for A, B, j0, j1 in _stage_coeffs(twiddles, increasing_strides, C):
        # Stage S applied after M (per kernel position k):  M <- S @ M
        M = A.T[:, :, None] * M[:, j0, :] + B.T[:, :, None] * M[:, j1, :]
    W = jnp.transpose(M, (1, 2, 0)).reshape(C, C * K) * (1.0 / K)   # (C, C*K)
    b = jnp.mean(last_bias, axis=0)                                  # (C,)
    return W, b


# ---------------------------------------------------------------------------
# im2col glue (F.unfold equivalent), plain JAX
# ---------------------------------------------------------------------------
def _im2col(x, kernel_size, stride, padding, dilation, h_out, w_out):
    B, C, H, W = x.shape
    kh, kw = kernel_size
    sh, sw = stride
    ph, pw = padding
    dh, dw = dilation
    xp = jnp.pad(x, ((0, 0), (0, 0), (ph, ph), (pw, pw)))
    pats = []
    for di in range(kh):
        for dj in range(kw):
            hs, ws = di * dh, dj * dw
            pats.append(xp[:, :,
                           hs:hs + (h_out - 1) * sh + 1:sh,
                           ws:ws + (w_out - 1) * sw + 1:sw])
    patches = jnp.stack(pats, axis=0)                     # (K, B, C, h_out, w_out)
    return patches.transpose(2, 0, 1, 3, 4).reshape(C, kh * kw, B * h_out * w_out)


# ---------------------------------------------------------------------------
# Pallas kernel: one MXU matmul + bias per tile of positions
# ---------------------------------------------------------------------------
def _butterfly_matmul_kernel(x_ref, w_ref, b_ref, o_ref):
    # x_ref: (C*K, TP)  im2col'd patch columns for this tile of positions
    # w_ref: (C, C*K)   pre-composed butterfly chain (includes 1/K of the mean)
    # b_ref: (C, 1)     pre-averaged last-layer bias
    # o_ref: (C, TP)
    acc = jnp.dot(w_ref[...], x_ref[...], preferred_element_type=jnp.float32)
    o_ref[...] = (acc + b_ref[...]).astype(o_ref.dtype)


def butterfly_conv2d_bbtbbt(x, twiddles, last_bias, *, kernel_size,
                            stride=(1, 1), padding=(0, 0), dilation=(1, 1),
                            tile_p=1024, compute_dtype=jnp.float32):
    """Forward pass of ButterflyConv2dBBTBBT (tied_weight=True, param='regular',
    real inputs, in_channels == out_channels == power of 2 so nstack == 1).

    compute_dtype may be set to jnp.bfloat16 on v6e/v7x to halve the HBM/VMEM
    traffic of the dominant x stream (f32 accumulation is kept either way).
    """
    B, C, H, W = x.shape
    OC = C
    kh, kw = kernel_size
    sh, sw = stride
    ph, pw = padding
    dh, dw = dilation
    h_out = (H + 2 * ph - dh * (kh - 1) - 1) // sh + 1
    # NOTE: the reference module uses `h` in the width formula too; reproduced verbatim.
    w_out = (H + 2 * pw - dw * (kw - 1) - 1) // sw + 1
    K = kh * kw
    CK = C * K
    m = int(math.log2(C))
    assert (1 << m) == C, "channels must be a power of 2 (nstack == 1 path)"

    # --- im2col (plain-JAX glue) ---------------------------------------------
    # TODO(synk): fold im2col into the kernel (K as a reduction grid axis over
    # shifted windows of the padded input) to avoid the Kx HBM materialization.
    x_ckp = _im2col(x, (kh, kw), (sh, sw), (ph, pw), (dh, dw), h_out, w_out)
    P = x_ckp.shape[-1]
    x_flat = x_ckp.reshape(CK, P).astype(compute_dtype)   # row index = ci*K + k

    # --- pre-compose the whole linear chain into one (C, C*K) matmul ---------
    W_mat, b_vec = _compose_weight(twiddles, last_bias,
                                   (False, True, False, True), C, K)
    W_mat = W_mat.astype(compute_dtype)
    b_col = b_vec.reshape(OC, 1).astype(jnp.float32)

    # --- tile the position (lane) axis ----------------------------------------
    P128 = _round_up(P, 128)
    TP = min(_round_up(max(tile_p, 128), 128), P128)
    # Keep >= 2 parallel grid steps when there is enough work (v7x: 2 TCs).
    if P128 >= 2 * 128 and P128 // TP < 2:
        TP = max(128, _round_up(P128 // 2, 128))
    P_pad = _round_up(P, TP)
    if P_pad != P:
        x_flat = jnp.pad(x_flat, ((0, 0), (0, P_pad - P)))

    itemsize = jnp.dtype(compute_dtype).itemsize
    vmem_est = (2 * _round_up(CK, 8) * TP * itemsize          # x, double-buffered
                + 2 * _round_up(OC, 8) * TP * 4               # out, double-buffered
                + 2 * _round_up(OC, 8) * _round_up(CK, 128) * itemsize   # W
                + 2 * _round_up(OC, 8) * 128 * 4)             # bias (padded)
    vmem_limit = int(min(48 * 2**20, max(16 * 2**20, 2 * vmem_est)))

    out = pl.pallas_call(
        _butterfly_matmul_kernel,
        out_shape=jax.ShapeDtypeStruct((OC, P_pad), jnp.float32),
        grid_spec=pltpu.PrefetchScalarGridSpec(
            num_scalar_prefetch=0,
            grid=(P_pad // TP,),
            in_specs=[
                pl.BlockSpec((CK, TP), lambda i: (0, i)),
                pl.BlockSpec((OC, CK), lambda i: (0, 0)),
                pl.BlockSpec((OC, 1), lambda i: (0, 0)),
            ],
            out_specs=pl.BlockSpec((OC, TP), lambda i: (0, i)),
        ),
        compiler_params=pltpu.CompilerParams(
            dimension_semantics=("parallel",),
            vmem_limit_bytes=vmem_limit),
    )(x_flat, W_mat, b_col)

    out = out[:, :P]                                       # (OC, B*h_out*w_out)
    return out.reshape(OC, B, h_out, w_out).transpose(1, 0, 2, 3)


# ---------------------------------------------------------------------------
# Pure-JAX reference (unrolled per-stage semantics) for a correctness check
# ---------------------------------------------------------------------------
def _reference_forward(x, twiddles, last_bias, *, kernel_size, stride, padding,
                       dilation):
    B, C, H, W = x.shape
    kh, kw = kernel_size
    sh, sw = stride
    ph, pw = padding
    dh, dw = dilation
    h_out = (H + 2 * ph - dh * (kh - 1) - 1) // sh + 1
    w_out = (H + 2 * pw - dw * (kw - 1) - 1) // sw + 1
    chans = _im2col(x, kernel_size, stride, padding, dilation, h_out, w_out)  # (C,K,P)
    for A, Bc, j0, j1 in _stage_coeffs(twiddles, (False, True, False, True), C):
        chans = A[:, :, None] * chans[j0] + Bc[:, :, None] * chans[j1]
    y = chans + jnp.transpose(last_bias)[:, :, None]       # (C, K, P)
    y = jnp.mean(y, axis=1)                                 # (C, P)
    return y.reshape(C, B, h_out, w_out).transpose(1, 0, 2, 3)


if __name__ == "__main__":
    key = jax.random.PRNGKey(0)
    B, C, H, W = 2, 4, 16, 16          # NCHW, in_channels == out_channels == 4
    OC = 4
    kh = kw = 3
    K = kh * kw

    k_x, k_t1, k_t2, k_t3, k_t4, k_b = jax.random.split(key, 6)
    x = jax.random.normal(k_x, (B, C, H, W), dtype=jnp.float32)

    # ButterflyBmm twiddle (tied_weight=True, param='regular'): (matrix_batch, n-1, 2, 2)
    scale = 1.0 / math.sqrt(2.0)
    twiddles = [
        jax.random.normal(k, (K, C - 1, 2, 2), dtype=jnp.float32) * scale
        for k in (k_t1, k_t2, k_t3, k_t4)
    ]
    # Bias only on the last ButterflyBmm layer: shape (matrix_batch, out_size)
    bound = 1.0 / math.sqrt(OC)
    last_bias = jax.random.uniform(k_b, (K, OC), minval=-bound, maxval=bound,
                                   dtype=jnp.float32)

    out = butterfly_conv2d_bbtbbt(
        x, twiddles, last_bias,
        kernel_size=(kh, kw), stride=(1, 1), padding=(1, 1), dilation=(1, 1))
    out = jax.block_until_ready(out)
    assert out.shape == (B, OC, H, W), out.shape
    assert out.dtype == jnp.float32

    ref = _reference_forward(
        x, twiddles, last_bias,
        kernel_size=(kh, kw), stride=(1, 1), padding=(1, 1), dilation=(1, 1))
    ref = jax.block_until_ready(ref)
    np.testing.assert_allclose(np.asarray(out), np.asarray(ref),
                               rtol=2e-2, atol=2e-2)
    print("KERNEL_OK")
</pallas_src>

<mosaic_0001>
module attributes {stable_mosaic.version = 11 : i64} {
  func.func @_butterfly_matmul_kernel(%arg0: i32, %arg1: memref<36x256xf32, #tpu.memory_space<vmem>>, %arg2: memref<4x36xf32, #tpu.memory_space<vmem>>, %arg3: memref<4x1xf32, #tpu.memory_space<vmem>>, %arg4: memref<4x256xf32, #tpu.memory_space<vmem>>) attributes {dimension_semantics = [#tpu.dimension_semantics<parallel>], iteration_bounds = array<i64: 2>, scalar_prefetch = 0 : i64, scratch_operands = 0 : i64, tpu.core_type = #tpu.core_type<tc>, window_params = [{transform_indices = @transform_0, window_bounds = array<i64: 36, 256>}, {pipeline_mode = #tpu.pipeline_mode<synchronous>, transform_indices = @transform_1, window_bounds = array<i64: 4, 36>}, {pipeline_mode = #tpu.pipeline_mode<synchronous>, transform_indices = @transform_2, window_bounds = array<i64: 4, 1>}, {transform_indices = @transform_3, window_bounds = array<i64: 4, 256>}]} {
    %c0 = arith.constant 0 : index
    %c0_0 = arith.constant 0 : index
    %0 = vector.load %arg2[%c0, %c0_0] : memref<4x36xf32, #tpu.memory_space<vmem>>, vector<4x36xf32>
    %c0_1 = arith.constant 0 : index
    %c0_2 = arith.constant 0 : index
    %1 = vector.load %arg1[%c0_1, %c0_2] : memref<36x256xf32, #tpu.memory_space<vmem>>, vector<36x256xf32>
    %cst = arith.constant dense<0.000000e+00> : vector<4x256xf32>
    %2 = tpu.matmul %0, %1, %cst {dimension_numbers = #tpu.dot_dimension_numbers<[1], [0], [0], [1], [0, 0, 1, 1], [], []>} : vector<4x36xf32>, vector<36x256xf32>, vector<4x256xf32> -> vector<4x256xf32>
    %c0_3 = arith.constant 0 : index
    %c0_4 = arith.constant 0 : index
    %3 = vector.load %arg3[%c0_3, %c0_4] : memref<4x1xf32, #tpu.memory_space<vmem>>, vector<4x1xf32>
    %4 = vector.broadcast %3 : vector<4x1xf32> to vector<4x256xf32>
    %5 = arith.addf %2, %4 : vector<4x256xf32>
    %c0_5 = arith.constant 0 : index
    %c0_6 = arith.constant 0 : index
    %6 = vector.load %arg4[%c0_5, %c0_6] : memref<4x256xf32, #tpu.memory_space<vmem>>, vector<4x256xf32>
    tpu.vector_store %arg4[%c0_5, %c0_6], %5 {strides = array<i32>} : memref<4x256xf32, #tpu.memory_space<vmem>>, vector<4x256xf32>,
    return
  }
  func.func @transform_0(%arg0: i32) -> (i32, i32) {
    %c0_i32 = arith.constant 0 : i32
    %c0_i32_0 = arith.constant 0 : i32
    return %c0_i32, %arg0 : i32, i32
  }
  func.func @transform_1(%arg0: i32) -> (i32, i32) {
    %c0_i32 = arith.constant 0 : i32
    %c0_i32_0 = arith.constant 0 : i32
    %c0_i32_1 = arith.constant 0 : i32
    return %c0_i32, %c0_i32_0 : i32, i32
  }
  func.func @transform_2(%arg0: i32) -> (i32, i32) {
    %c0_i32 = arith.constant 0 : i32
    %c0_i32_0 = arith.constant 0 : i32
    %c0_i32_1 = arith.constant 0 : i32
    return %c0_i32, %c0_i32_0 : i32, i32
  }
  func.func @transform_3(%arg0: i32) -> (i32, i32) {
    %c0_i32 = arith.constant 0 : i32
    %c0_i32_0 = arith.constant 0 : i32
    return %c0_i32, %arg0 : i32, i32
  }
}

</mosaic_0001>

<bundles_post_ra>
// kernel: tpu_custom_call.1
= control target key start
LH: loop header
LB: loop body
LE: loop exit
PB: predicated region body
PF: predicated region fallthrough
CT: control target
= control target key end

     0   :  { %8 = vsyncpa [#allocation3], 0  ;;  %s676_s0 = inlined_call_operand.hbm [shape: f32[36,512], index: 0, kind: input, shape index: {}]   ;;  %s677_s1 = inlined_call_operand.vmem [shape: f32[4,36], index: 1, kind: input, shape index: {}]   ;;  %s678_s2 = inlined_call_operand.vmem [shape: f32[4,1], index: 2, kind: input, shape index: {}]   ;;  %s679_s3 = inlined_call_operand.hbm [shape: f32[4,512], index: 3, kind: output, shape index: {}]  }
   0x1   :  { %10 = vsyncpa [#allocation3 + $0x1], 0 }
   0x2   :  { %11 = vsyncpa [#allocation4], 0 }
   0x3   :  { %13 = vsyncpa [#allocation4 + $0x1], 0  ;;  %s547_s12 = smov 0   ;;  %s549_s13 = smov 0  }
   0x4   :  { %s551_s14 = smov 0   ;;  %s553_s15 = smov 0  }
   0x5 LB: > { %s568_s16 = sadd.s32 4294967295, %s521_s15   ;;  %s354_s17 = sadd.s32 4294967294, %s521_s15   ;;  %s521_s15 = sphi %s553_s15, %s687_s15   ;;  %s517_s14 = sphi %s551_s14, %s686_s14   ;;  %s513_s13 = sphi %s549_s13, %s685_s13   ;;  %s509_s12 = sphi %s547_s12, %s684_s12  }
   0x6   : > { %s572_s18 = sadd.s32 1, %s521_s15   ;;  %s26_s19 = sadd.s32 1, %s517_s14 }
   0x7   : > { %s23_s20 = ssub.s32 %s521_s15, %s572_s18  ;;  %p33_p0 = scmp.ne.s32.totalorder %s517_s14, %s513_s13 }
   0x8   : > { %p24_p1 = scmp.eq.s32.totalorder %s23_s20, 0  ;;  %p34_p2 = scmp.eq.s32.totalorder %s521_s15, 0 }
   0x9   : > { %p39_p3 = scmp.ne.s32.totalorder %s513_s13, %s509_s12  ;;  %p40_p4 = scmp.eq.s32.totalorder %s568_s16, 0 }
   0xa   : > { %s584_s21 = scalar_select %p24_p1, %s517_s14, %s26_s19  }
   0xb   : > { %p35_p5 = por %p34_p2, %p33_p0  ;;  %p586_p6 = por %p40_p4, %p39_p3 }
   0xc   : > { %p105_p7 = scmp.eq.s32.totalorder %s568_s16, 1  ;;  %p111_p8 = scmp.eq.s32.totalorder %s354_s17, 1 }
   0xd   : > { %p356_p9 = scmp.ge.s32.totalorder %s521_s15, 2  ;;  %p386_p10 = scmp.lt.s32.totalorder %s521_s15, 2 }
   0xe   : > { %p593_p11 = por %p105_p7, %p33_p0  ;;  %p597_p12 = por %p111_p8, %p39_p3 }
   0xf   : > { %s137_s25 = sand.u32 1, %s517_s14   ;;  %s370_s26 = sshll.u32 %s521_s15, 4 }
  0x10   : > { %s372_s27 = smul.u32 80, %s137_s25  ;;  %s146_s30 = scalar_lea.hbm %s676_s0, %s370_s26 }
  0x11   : > { %p606_p13 = pnand %p386_p10, %p35_p5  ;;  %s147_s5 = sshll.u32 %s146_s30, 4  ;;  %s148_s5 = int_to_ptr.hbm [resolvable:$true] %s147_s5 }
  0x12   : > { %s141_s6 = scalar_lea.vmem [#allocation2], %s372_s27  ;;  %p359_p0 = scmp.ge.s32.totalorder %s521_s15, 1 }
  0x13   : > { %s149_s7 = sshll.u32 %s141_s6, 4  ;;  %s138_s8 = scalar_lea.sflag [#allocation3], %s137_s25  ;;  %s150_s7 = int_to_ptr.vmem [resolvable:$true] %s149_s7 }
  0x14   : > { %s425_s9 = sshra.s32 %s148_s5, 4  ;;  %p429_p2 = pneg %p606_p13  ;;  %s426_s9 = int_to_ptr.hbm [resolvable:$true] %s425_s9 }
  0x15   : > { %s427_s10 = scalar_lea.hbm %s426_s9, 80  ;;  %s432_s19 = scalar_lea.hbm %s676_s0, 160 }
  0x16   : > { %p428_p1 = scmp.ne.s32.totalorder %s426_s9, %s427_s10  ;;  %p433_p5 = scmp.lt.s32.totalorder %s426_s9, %s676_s0 }
  0x17   : > { %p434_p7 = scmp.lt.s32.totalorder %s432_s19, %s427_s10 }
  0x18   : > { %p430_p3 = pnand %p429_p2, %p428_p1 }
  0x19   : > { %p435_p8 = por %p434_p7, %p433_p5 }
  0x1a   : > { %p431_p4 = pneg %p430_p3 }
  0x1c   : > { %p436_p10 = pnand %p435_p8, %p431_p4 }
  0x1e   : > { %439 = shalt.err (!%p436_p10)
}
  0x1f   : > { %s523_s25 = smov 512   ;;  %s524_s27 = smov 256  }
  0x20   : > { %s525_s28 = smov 16   ;;  %p157_p1 = scmp.lt.s32.totalorder %s521_s15, 3 }
  0x21   : > { %381 = dma.hbm_to_vmem [thread:$0]  (!%p606_p13), %s148_s5, 1280, %s150_s7, %s138_s8, %s523_s25, %s524_s27, %s525_s28  }
  0x22   : > { %p158_p2 = pnand %p359_p0, %p157_p1 }
  0x23   : > { %s625_s29 = sand.u32 (!%p158_p2), 1, %s513_s13  }
  0x24   : > { %161 = sbr.rel (%p158_p2) target bundleno = 187 (0xbb), region = 32  ;;  %s164_s6 = scalar_lea.sflag (!%p158_p2), [#allocation3], %s625_s29 }
  0x25   : > { %s373_s30 = smul.u32 (!%p158_p2), 80, %s625_s29 }
  0x27   : > { %s167_s9 = scalar_lea.vmem (!%p158_p2), [#allocation2], %s373_s30 }
  0x29   : > { %500 = dma.done.wait (%p586_p6), %s164_s6, 1280  }
  0x2a   : > { %502 = vsyncadd (%p586_p6), %s164_s6, 4294966016  ;;  %v526_v0 = vmov 0   ;;  %vm214_vm0 = vcmask 1043456   ;;  %v202_v1 = vld [vmem:[%s167_s9 + $0x40] sm:$0xf]  ;;  %v200_v3 = vld [vmem:[%s167_s9 + $0x30] sm:$0xff] }
  0x2b   : > { %424 = vset.pattern.permute.xlu0 %v526_v0  ;;  %v203_v2 = vld [vmem:[%s167_s9 + $0x48] sm:$0xf]  ;;  %361 = vmatpush.msk.msra.mxu0 %vm214_vm0, %v202_v1  ;;  %v201_v4 = vld [vmem:[%s167_s9 + $0x38] sm:$0xff]  ;;  %v198_v5 = vld [vmem:[%s167_s9 + $0x20] sm:$0xff]  ;;  %vm210_vm1 = vcmask 293888   ;;  %s360_s8 = sshll.u32 %s625_s29, 3 }
  0x2c   : > { %363 = vmatpush.msk.msra.mxu1 %vm214_vm0, %v203_v2  ;;  %v199_v6 = vld [vmem:[%s167_s9 + $0x28] sm:$0xff]  ;;  %v204_v7 = vld [vmem:[%s678_s2] sm:$0xf]  ;;  %v197_v9 = vld [vmem:[%s167_s9 + $0x18] sm:$0xff]  ;;  %s371_s10 = sshll.u32 %s568_s16, 3  ;;  %s190_s20 = scalar_lea.vmem [#allocation5], %s360_s8 }
  0x2d   : > { %233 = vmatpush.msra.mxu0 %v200_v3  ;;  %v196_v8 = vld [vmem:[%s167_s9 + $0x10] sm:$0xff]  ;;  %207 = vperm.xlu0 %424, %v204_v7   ;;  %v194_v10 = vld [vmem:[%s167_s9] sm:$0xff]  ;;  %v195_v11 = vld [vmem:[%s167_s9 + $0x8] sm:$0xff]  ;;  %s279_s19 = scalar_lea.hbm %s679_s3, %s371_s10  ;;  %s281_s26 = sshll.u32 %s190_s20, 4  ;;  %s282_s26 = int_to_ptr.vmem [resolvable:$true] %s281_s26 }
  0x2e   : > { %253 = vmatpush.msra.mxu1 %v201_v4  ;;  %v193_v12 = vld [vmem:[%s677_s1] sm:$0xf]  ;;  %s283_s25 = sshll.u32 %s279_s19, 4  ;;  %s268_s16 = scalar_lea.sflag [#allocation4], %s625_s29  ;;  %s284_s25 = int_to_ptr.hbm [resolvable:$true] %s283_s25 }
  0x2f   : > { %234 = vmatpush.msra.mxu0 %v198_v5  ;;  %s469_s27 = sshra.s32 %s284_s25, 4  ;;  %s475_s9 = scalar_lea.hbm %s679_s3, 16  ;;  %s470_s27 = int_to_ptr.hbm [resolvable:$true] %s469_s27 }
  0x30   : > { %254 = vmatpush.msra.mxu1 %v199_v6  ;;  %s471_s28 = scalar_lea.hbm %s470_s27, 8  ;;  %p476_p3 = scmp.lt.s32.totalorder %s470_s27, %s679_s3 }
  0x31   : > { %235 = vmatpush.msra.mxu0 %v196_v8  ;;  %p472_p6 = scmp.ne.s32.totalorder %s470_s27, %s471_s28  ;;  %p477_p4 = scmp.lt.s32.totalorder %s475_s9, %s471_s28 }
  0x32   : > { %255 = vmatpush.msra.mxu1 %v197_v9 }
  0x33   : > { %236 = vmatpush.msra.mxu0 %v194_v10  ;;  %p473_p13 = pnand %p472_p6, %p593_p11  ;;  %p478_p5 = por %p477_p4, %p476_p3 }
  0x34   : > { %256 = vmatpush.msra.mxu1 %v195_v11  ;;  %362 = vmatmul.msk.f32.vlgmr.msra.gmra.mxu0 %vm210_vm1, %v193_v12 }
  0x35   : > { %364 = vmatmul.msk.f32.vlgmr.msra.gmra.mxu1 %vm210_vm1, %v193_v12  ;;  %p474_p0 = pneg %p473_p13 }
  0x37   : > { %p479_p7 = pnand %p478_p5, %p474_p0 }
  0x9f   : > { %v208_v13 = vpop.permute.xlu0 %207 }
  0xb1   : > { %v238_v14 = vpop.f32.mrf.mxu0 }
  0xb2   : > { %v258_v15 = vpop.f32.mrf.mxu1  ;;  %v239_v17 = vadd.f32 %v238_v14, %v208_v13 }
  0xb3   : > { %v259_v16 = vadd.f32 %v258_v15, %v208_v13 }
  0xb5   : > { %v263_v18 = vrot.slane %v259_v16, 4 }
  0xb7   : > { %v264_v19 = vsel %vm214_vm0, %v239_v17, %v263_v18 }
  0xb8   : > { %266 = vst [vmem:[%s190_s20] sm:$0xff] %v264_v19 }
  0xb9   : > { %482 = shalt.err (!%p479_p7)
}
  0xba   : > { %376 = dma.vmem_to_hbm [thread:$0]  (%p593_p11), %s282_s26, 128, %s284_s25, %s268_s16  }
  0xbb PF: > { %s295_s29 = sand.u32 1, %s509_s12   ;;  %p383_p8 = pnand %p356_p9, %p597_p12 }
  0xbc   : > { %s296_s22 = scalar_lea.sflag [#allocation4], %s295_s29 }
  0xbd   : > { %p384_p10 = pneg %p383_p8 }
  0xbf   : > { %504 = dma.done.wait (%p384_p10), %s296_s22, 128  }
  0xc0   : > { %506 = vsyncadd (%p384_p10), %s296_s22, 4294967168  ;;  %p16_p1 = scmp.ge.s32.totalorder %s572_s18, 4   ;;  %s684_s12 = smov %s513_s13 }
  0xc1   : > { %s685_s13 = smov %s517_s14  ;;  %s686_s14 = smov %s584_s21 }
  0xc2   : > { %s687_s15 = smov %s572_s18  ;;  %18 = sbr.rel (!%p16_p1) target bundleno = 5 (0x5), region = 77 }
  0xc7   :  { %302 = vsyncpa [#allocation3], 1 }
  0xc8   :  { %304 = vsyncpa [#allocation3 + $0x1], 1 }
  0xc9   :  { %305 = vsyncpa [#allocation4], 1 }
  0xca   :  { %307 = vsyncpa [#allocation4 + $0x1], 1 }

</bundles_post_ra>
